<compile_context>
chip_gen: v7x
topology: tpu7x:2x2x1
jax: 0.10.0
libtpu: 0.0.40
codegen_flags: <defaults>
</compile_context>

<pallas_src>
import math
import functools

import jax
import jax.numpy as jnp
from jax import lax
from jax.experimental import pallas as pl
from jax.experimental.pallas import tpu as pltpu


_SQRT_HALF = 1.0 / math.sqrt(2.0)


def _gelu(x, approximate=False):
    if approximate:
        # tanh formulation -> EUP slot (otherwise idle); accuracy delta vs erf.
        return jax.nn.gelu(x, approximate=True)
    # matches torch.nn.GELU() default (erf formulation)
    return 0.5 * x * (1.0 + lax.erf(x * _SQRT_HALF))


# ---------------------------------------------------------------------------
# Kernels
# ---------------------------------------------------------------------------

def _mlp_kernel_resident(x_ref, w1_ref, b1_ref, w2_ref, b2_ref, o_ref, *,
                         approx_gelu):
    # Whole hidden dim in-block; weights resident in VMEM across all row tiles.
    h = jnp.dot(x_ref[...], w1_ref[...], preferred_element_type=jnp.float32)
    h = _gelu(h + b1_ref[...].astype(jnp.float32), approx_gelu)
    y = jnp.dot(h.astype(w2_ref.dtype), w2_ref[...],
                preferred_element_type=jnp.float32)
    o_ref[...] = (y + b2_ref[...].astype(jnp.float32)).astype(o_ref.dtype)


def _mlp_kernel_stream(x_ref, w1_ref, b1_ref, w2_ref, b2_ref, o_ref, acc_ref,
                       *, approx_gelu):
    # x_ref:  (tm, C)     w1_ref: (C, th)    b1_ref: (1, th)
    # w2_ref: (th, C)     b2_ref: (1, C)     o_ref:  (tm, C)
    # acc_ref: (tm, C) f32, persistent across the hidden-dim grid axis.
    j = pl.program_id(1)

    h = jnp.dot(x_ref[...], w1_ref[...], preferred_element_type=jnp.float32)
    h = _gelu(h + b1_ref[...].astype(jnp.float32), approx_gelu)
    contrib = jnp.dot(h.astype(w2_ref.dtype), w2_ref[...],
                      preferred_element_type=jnp.float32)

    @pl.when(j == 0)
    def _():
        acc_ref[...] = contrib          # direct write: no zero-init + RMW

    @pl.when(j > 0)
    def _():
        acc_ref[...] += contrib

    @pl.when(j == pl.num_programs(1) - 1)
    def _():
        o_ref[...] = (acc_ref[...]
                      + b2_ref[...].astype(jnp.float32)).astype(o_ref.dtype)


# ---------------------------------------------------------------------------
# Tile / VMEM selection
# ---------------------------------------------------------------------------

def _round_up(x, m):
    return ((x + m - 1) // m) * m


def _physical_vmem_bytes():
    try:
        return int(pltpu.get_tpu_info().vmem_capacity_bytes)
    except Exception:
        return 64 << 20   # conservative: v7x per-TensorCore VMEM


def _vmem_estimate(tm, th, C, x_sz, w_sz, out_sz):
    # Double-buffered pipeline buffers + scratch + compiler-managed
    # intermediates (f32 GELU tile and its low-precision cast).
    return (2 * tm * C * x_sz                        # x tiles
            + 2 * tm * C * out_sz                    # out tiles
            + 2 * (C * th + th * C + th + C) * w_sz  # w1/b1/w2/b2 tiles
            + tm * C * 4                             # f32 accumulator / result
            + tm * th * 4                            # f32 GELU intermediate h
            + tm * th * w_sz)                        # cast of h for 2nd matmul


def _hidden_tile_candidates(H, max_th=512):
    # th must be a multiple of 128 dividing H (lane constraint), or H itself.
    cands = []
    t = min(max_th, H)
    t -= t % 128
    while t >= 128:
        if H % t == 0:
            cands.append(t)
        t -= 128
    if not cands:
        cands.append(H)
    return cands


def _select_tiles(M, C, H, x_sz, w_sz, out_sz, budget, tm_hint, th_hint):
    granule = 128 if M >= 128 else 16
    M_round = _round_up(M, granule)
    if tm_hint is not None:
        tm_max = _round_up(tm_hint, granule)
    else:
        # tm is the weight-reuse lever: 1024 on big-VMEM parts, 512 otherwise.
        tm_max = 1024 if budget >= (72 << 20) else 512
    tm_max = max(granule, min(tm_max, M_round))

    def best_tm(th):
        t = tm_max
        while t > granule and _vmem_estimate(t, th, C, x_sz, w_sz, out_sz) > budget:
            t = max(granule, _round_up(t // 2, granule))
        if _vmem_estimate(t, th, C, x_sz, w_sz, out_sz) <= budget:
            return t
        return None

    if th_hint is not None:
        assert H % th_hint == 0, "th must divide the hidden dim (4*n_embd)"
        t = best_tm(th_hint)
        return (t if t is not None else granule), th_hint

    # 1) Fully-resident weights (th = H): constant weight block indices mean
    #    Pallas fetches w1/w2 exactly once for the whole grid.
    t = best_tm(H)
    if t is not None:
        return t, H
    # 2) Stream the hidden dim, largest 128-multiple divisor of H first.
    for th in _hidden_tile_candidates(H):
        t = best_tm(th)
        if t is not None:
            return t, th
    # 3) Last resort: smallest tiles.
    return granule, _hidden_tile_candidates(H)[-1]


# ---------------------------------------------------------------------------
# Forward wrapper
# ---------------------------------------------------------------------------

@functools.partial(jax.jit,
                   static_argnames=("tm", "th", "approximate_gelu",
                                    "compute_dtype"))
def mlp_forward(x, w1, b1, w2, b2, *, tm=None, th=None,
                approximate_gelu=False, compute_dtype=None):
    """x: [B, T, C] -> [B, T, C].  w1: [C, 4C], w2: [4C, C]."""
    B, T, C = x.shape
    H = w1.shape[1]  # 4*C
    M = B * T
    out_dtype = x.dtype

    if compute_dtype is not None:
        # bf16 operands: ~3x MXU throughput & half the weight HBM traffic.
        x = x.astype(compute_dtype)
        w1 = w1.astype(compute_dtype)
        b1 = b1.astype(compute_dtype)
        w2 = w2.astype(compute_dtype)
        b2 = b2.astype(compute_dtype)

    x_sz = jnp.dtype(x.dtype).itemsize
    w_sz = jnp.dtype(w1.dtype).itemsize
    out_sz = jnp.dtype(out_dtype).itemsize

    physical = _physical_vmem_bytes()
    budget = min(int(physical * 0.80), 104 << 20)   # never ask for all of VMEM

    tm_sel, th_sel = _select_tiles(M, C, H, x_sz, w_sz, out_sz, budget, tm, th)

    M_pad = pl.cdiv(M, tm_sel) * tm_sel
    x2d = x.reshape(M, C)
    if M_pad != M:
        x2d = jnp.pad(x2d, ((0, M_pad - M), (0, 0)))
    b1_2d = b1.reshape(1, H)
    b2_2d = b2.reshape(1, C)

    n_row = M_pad // tm_sel
    est = _vmem_estimate(tm_sel, th_sel, C, x_sz, w_sz, out_sz)
    vmem_limit = min(int(est * 1.2) + (4 << 20), int(physical * 0.85))

    w_total_bytes = (2 * C * H + H + C) * w_sz
    weight_passes = 1 if th_sel == H else n_row
    cost = pl.CostEstimate(
        flops=4 * M * C * H,                       # two MxCxH matmuls
        transcendentals=M * H,                     # erf/tanh per hidden act
        bytes_accessed=(M * C * x_sz + M * C * out_sz
                        + w_total_bytes * weight_passes),
    )

    if th_sel == H:
        kernel = functools.partial(_mlp_kernel_resident,
                                   approx_gelu=approximate_gelu)
        grid = (n_row,)
        in_specs = [
            pl.BlockSpec((tm_sel, C), lambda i: (i, 0)),   # x rows tile
            pl.BlockSpec((C, H), lambda i: (0, 0)),        # w1 (resident)
            pl.BlockSpec((1, H), lambda i: (0, 0)),        # b1
            pl.BlockSpec((H, C), lambda i: (0, 0)),        # w2 (resident)
            pl.BlockSpec((1, C), lambda i: (0, 0)),        # b2
        ]
        out_specs = pl.BlockSpec((tm_sel, C), lambda i: (i, 0))
        scratch_shapes = ()
        dim_sem = ("parallel",)
    else:
        kernel = functools.partial(_mlp_kernel_stream,
                                   approx_gelu=approximate_gelu)
        grid = (n_row, H // th_sel)
        in_specs = [
            pl.BlockSpec((tm_sel, C), lambda i, j: (i, 0)),   # x rows tile
            pl.BlockSpec((C, th_sel), lambda i, j: (0, j)),   # w1 hidden tile
            pl.BlockSpec((1, th_sel), lambda i, j: (0, j)),   # b1 hidden tile
            pl.BlockSpec((th_sel, C), lambda i, j: (j, 0)),   # w2 hidden tile
            pl.BlockSpec((1, C), lambda i, j: (0, 0)),        # b2
        ]
        out_specs = pl.BlockSpec((tm_sel, C), lambda i, j: (i, 0))
        scratch_shapes = (pltpu.VMEM((tm_sel, C), jnp.float32),)
        dim_sem = ("parallel", "arbitrary")

    out2d = pl.pallas_call(
        kernel,
        out_shape=jax.ShapeDtypeStruct((M_pad, C), out_dtype),
        grid_spec=pltpu.PrefetchScalarGridSpec(
            num_scalar_prefetch=0,
            grid=grid,
            in_specs=in_specs,
            out_specs=out_specs,
            scratch_shapes=scratch_shapes,
        ),
        compiler_params=pltpu.CompilerParams(
            dimension_semantics=dim_sem,
            vmem_limit_bytes=vmem_limit),
        cost_estimate=cost,
    )(x2d, w1, b1_2d, w2, b2_2d)

    if M_pad != M:
        out2d = out2d[:M]
    return out2d.reshape(B, T, C)


def init_params(key, n_embd, dtype=jnp.float32):
    """Deterministic init mimicking torch Linear (uniform +/- 1/sqrt(fan_in))."""
    k1, k2, k3, k4 = jax.random.split(key, 4)
    hid = 4 * n_embd
    lim1 = 1.0 / math.sqrt(n_embd)
    lim2 = 1.0 / math.sqrt(hid)
    # stored as [in, out] so the kernel does x @ w
    w1 = jax.random.uniform(k1, (n_embd, hid), dtype, -lim1, lim1)
    b1 = jax.random.uniform(k2, (hid,), dtype, -lim1, lim1)
    w2 = jax.random.uniform(k3, (hid, n_embd), dtype, -lim2, lim2)
    b2 = jax.random.uniform(k4, (n_embd,), dtype, -lim2, lim2)
    return w1, b1, w2, b2


def _ref_mlp(x, w1, b1, w2, b2):
    B, T, C = x.shape
    h = jax.nn.gelu(x.reshape(-1, C) @ w1 + b1, approximate=False)
    return (h @ w2 + b2).reshape(B, T, C)


if __name__ == "__main__":
    key = jax.random.PRNGKey(0)

    # Test 1: small config (resident-weights path).  batch=2, seq=8, n_embd=32.
    B, T, C = 2, 8, 32
    kx, kp, key = jax.random.split(key, 3)
    x = jax.random.normal(kx, (B, T, C), jnp.float32)
    w1, b1, w2, b2 = init_params(kp, C)
    out = jax.block_until_ready(mlp_forward(x, w1, b1, w2, b2))
    ref = _ref_mlp(x, w1, b1, w2, b2)
    assert out.shape == (B, T, C)
    assert jnp.allclose(out, ref, atol=2e-5, rtol=2e-5), "mismatch (resident)"

    # Test 2: force the hidden-dim streaming path (th < H) to validate it too.
    B2, T2, C2 = 2, 8, 64          # H = 256, th = 128 -> 2 hidden tiles
    kx2, kp2, key = jax.random.split(key, 3)
    x2 = jax.random.normal(kx2, (B2, T2, C2), jnp.float32)
    p2 = init_params(kp2, C2)
    out2 = jax.block_until_ready(mlp_forward(x2, *p2, th=128))
    ref2 = _ref_mlp(x2, *p2)
    assert out2.shape == (B2, T2, C2)
    assert jnp.allclose(out2, ref2, atol=2e-5, rtol=2e-5), "mismatch (stream)"

    print("KERNEL_OK")
</pallas_src>

<mosaic_0001>
module attributes {stable_mosaic.version = 11 : i64} {
  func.func @_mlp_kernel_resident(%arg0: i32, %arg1: memref<16x32xf32, #tpu.memory_space<vmem>>, %arg2: memref<32x128xf32, #tpu.memory_space<vmem>>, %arg3: memref<1x128xf32, #tpu.memory_space<vmem>>, %arg4: memref<128x32xf32, #tpu.memory_space<vmem>>, %arg5: memref<1x32xf32, #tpu.memory_space<vmem>>, %arg6: memref<16x32xf32, #tpu.memory_space<vmem>>) attributes {dimension_semantics = [#tpu.dimension_semantics<parallel>], iteration_bounds = array<i64: 1>, scalar_prefetch = 0 : i64, scratch_operands = 0 : i64, tpu.core_type = #tpu.core_type<tc>, window_params = [{transform_indices = @transform_0, window_bounds = array<i64: 16, 32>}, {pipeline_mode = #tpu.pipeline_mode<synchronous>, transform_indices = @transform_1, window_bounds = array<i64: 32, 128>}, {pipeline_mode = #tpu.pipeline_mode<synchronous>, transform_indices = @transform_2, window_bounds = array<i64: 1, 128>}, {pipeline_mode = #tpu.pipeline_mode<synchronous>, transform_indices = @transform_3, window_bounds = array<i64: 128, 32>}, {pipeline_mode = #tpu.pipeline_mode<synchronous>, transform_indices = @transform_4, window_bounds = array<i64: 1, 32>}, {transform_indices = @transform_5, window_bounds = array<i64: 16, 32>}]} {
    %c0 = arith.constant 0 : index
    %c0_0 = arith.constant 0 : index
    %0 = vector.load %arg1[%c0, %c0_0] : memref<16x32xf32, #tpu.memory_space<vmem>>, vector<16x32xf32>
    %c0_1 = arith.constant 0 : index
    %c0_2 = arith.constant 0 : index
    %1 = vector.load %arg2[%c0_1, %c0_2] : memref<32x128xf32, #tpu.memory_space<vmem>>, vector<32x128xf32>
    %cst = arith.constant dense<0.000000e+00> : vector<16x128xf32>
    %2 = tpu.matmul %0, %1, %cst {dimension_numbers = #tpu.dot_dimension_numbers<[1], [0], [0], [1], [0, 0, 1, 1], [], []>} : vector<16x32xf32>, vector<32x128xf32>, vector<16x128xf32> -> vector<16x128xf32>
    %c0_3 = arith.constant 0 : index
    %c0_4 = arith.constant 0 : index
    %3 = vector.load %arg3[%c0_3, %c0_4] : memref<1x128xf32, #tpu.memory_space<vmem>>, vector<1x128xf32>
    %4 = vector.broadcast %3 : vector<1x128xf32> to vector<16x128xf32>
    %5 = arith.addf %2, %4 : vector<16x128xf32>
    %cst_5 = arith.constant 5.000000e-01 : f32
    %6 = vector.broadcast %cst_5 : f32 to vector<16x128xf32>
    %7 = arith.mulf %6, %5 : vector<16x128xf32>
    %cst_6 = arith.constant 0.707106769 : f32
    %8 = vector.broadcast %cst_6 : f32 to vector<16x128xf32>
    %9 = arith.mulf %5, %8 : vector<16x128xf32>
    %10 = math.erf %9 : vector<16x128xf32>
    %cst_7 = arith.constant 1.000000e+00 : f32
    %11 = vector.broadcast %cst_7 : f32 to vector<16x128xf32>
    %12 = arith.addf %11, %10 : vector<16x128xf32>
    %13 = arith.mulf %7, %12 : vector<16x128xf32>
    %c0_8 = arith.constant 0 : index
    %c0_9 = arith.constant 0 : index
    %14 = vector.load %arg4[%c0_8, %c0_9] : memref<128x32xf32, #tpu.memory_space<vmem>>, vector<128x32xf32>
    %cst_10 = arith.constant dense<0.000000e+00> : vector<16x32xf32>
    %15 = tpu.matmul %13, %14, %cst_10 {dimension_numbers = #tpu.dot_dimension_numbers<[1], [0], [0], [1], [0, 0, 1, 1], [], []>} : vector<16x128xf32>, vector<128x32xf32>, vector<16x32xf32> -> vector<16x32xf32>
    %c0_11 = arith.constant 0 : index
    %c0_12 = arith.constant 0 : index
    %16 = vector.load %arg5[%c0_11, %c0_12] : memref<1x32xf32, #tpu.memory_space<vmem>>, vector<1x32xf32>
    %17 = vector.broadcast %16 : vector<1x32xf32> to vector<16x32xf32>
    %18 = arith.addf %15, %17 : vector<16x32xf32>
    %c0_13 = arith.constant 0 : index
    %c0_14 = arith.constant 0 : index
    %19 = vector.load %arg6[%c0_13, %c0_14] : memref<16x32xf32, #tpu.memory_space<vmem>>, vector<16x32xf32>
    tpu.vector_store %arg6[%c0_13, %c0_14], %18 {strides = array<i32>} : memref<16x32xf32, #tpu.memory_space<vmem>>, vector<16x32xf32>,
    return
  }
  func.func @transform_0(%arg0: i32) -> (i32, i32) {
    %c0_i32 = arith.constant 0 : i32
    %c0_i32_0 = arith.constant 0 : i32
    return %arg0, %c0_i32 : i32, i32
  }
  func.func @transform_1(%arg0: i32) -> (i32, i32) {
    %c0_i32 = arith.constant 0 : i32
    %c0_i32_0 = arith.constant 0 : i32
    %c0_i32_1 = arith.constant 0 : i32
    return %c0_i32, %c0_i32_0 : i32, i32
  }
  func.func @transform_2(%arg0: i32) -> (i32, i32) {
    %c0_i32 = arith.constant 0 : i32
    %c0_i32_0 = arith.constant 0 : i32
    %c0_i32_1 = arith.constant 0 : i32
    return %c0_i32, %c0_i32_0 : i32, i32
  }
  func.func @transform_3(%arg0: i32) -> (i32, i32) {
    %c0_i32 = arith.constant 0 : i32
    %c0_i32_0 = arith.constant 0 : i32
    %c0_i32_1 = arith.constant 0 : i32
    return %c0_i32, %c0_i32_0 : i32, i32
  }
  func.func @transform_4(%arg0: i32) -> (i32, i32) {
    %c0_i32 = arith.constant 0 : i32
    %c0_i32_0 = arith.constant 0 : i32
    %c0_i32_1 = arith.constant 0 : i32
    return %c0_i32, %c0_i32_0 : i32, i32
  }
  func.func @transform_5(%arg0: i32) -> (i32, i32) {
    %c0_i32 = arith.constant 0 : i32
    %c0_i32_0 = arith.constant 0 : i32
    return %arg0, %c0_i32 : i32, i32
  }
}

</mosaic_0001>

<bundles_post_ra>
// kernel: mlp_forward.1
= control target key start
LH: loop header
LB: loop body
LE: loop exit
PB: predicated region body
PF: predicated region fallthrough
CT: control target
= control target key end

     0   :  { %vm34_vm0 = vcmask 261120   ;;  %s508_s0 = inlined_call_operand.vmem [shape: f32[16,32], index: 0, kind: input, shape index: {}]   ;;  %s509_s1 = inlined_call_operand.vmem [shape: f32[32,128], index: 1, kind: input, shape index: {}]   ;;  %s510_s2 = inlined_call_operand.vmem [shape: f32[1,128], index: 2, kind: input, shape index: {}]   ;;  %s511_s3 = inlined_call_operand.vmem [shape: f32[128,32], index: 3, kind: input, shape index: {}]   ;;  %s512_s4 = inlined_call_operand.vmem [shape: f32[1,32], index: 4, kind: input, shape index: {}]   ;;  %s513_s5 = inlined_call_operand.hbm [shape: f32[16,32], index: 5, kind: output, shape index: {}]  }
   0x1   :  { %v23_v0 = vld [vmem:[%s509_s1] sm:$0xff]  ;;  %v24_v1 = vld [vmem:[%s509_s1 + $0x8] sm:$0xff]  ;;  %v25_v2 = vld [vmem:[%s509_s1 + $0x10] sm:$0xff] }
   0x2   :  { %v316_v3 = vpack.c.bf16 %v24_v1, %v23_v0  ;;  %v26_v4 = vld [vmem:[%s509_s1 + $0x18] sm:$0xff]  ;;  %v21_v5 = vld [vmem:[%s508_s0] sm:$0xff]  ;;  %v127_v8 = vld [vmem:[%s511_s3 + $0x8] sm:$0xff] }
   0x3   :  { %v320_v6 = vpack.c.bf16 %v26_v4, %v25_v2  ;;  %278 = vmatprep.mubr.msk.f32.mxu0 %vm34_vm0, %v21_v5  ;;  %v126_v7 = vld [vmem:[%s511_s3] sm:$0xff]  ;;  %v128_v9 = vld [vmem:[%s511_s3 + $0x10] sm:$0xff]  ;;  %v129_v11 = vld [vmem:[%s511_s3 + $0x18] sm:$0xff] }
   0x4   :  { %317 = vmatprep.subr.bf16.mxu0 %v316_v3  ;;  %v324_v10 = vpack.c.bf16 %v127_v8, %v126_v7  ;;  %v328_v12 = vpack.c.bf16 %v129_v11, %v128_v9  ;;  %v130_v13 = vld [vmem:[%s511_s3 + $0x20] sm:$0xff]  ;;  %v131_v14 = vld [vmem:[%s511_s3 + $0x28] sm:$0xff] }
   0x5   :  { %319 = vmatpush3.bf16.msra.mxu0 %v316_v3 }
   0x6   :  { %10 = vsyncpa [#allocation3], 0  ;;  %321 = vmatprep.subr.bf16.mxu0 %v320_v6  ;;  %325 = vmatprep.subr.bf16.mxu1 %v324_v10  ;;  %v332_v15 = vpack.c.bf16 %v131_v14, %v130_v13  ;;  %v22_v16 = vld [vmem:[%s508_s0 + $0x8] sm:$0xff]  ;;  %v132_v17 = vld [vmem:[%s511_s3 + $0x30] sm:$0xff]  ;;  %s387_s11 = smov [#allocation2]  }
   0x7   :  { %327 = vmatpush3.bf16.msra.mxu1 %v324_v10  ;;  %v133_v18 = vld [vmem:[%s511_s3 + $0x38] sm:$0xff]  ;;  %v134_v20 = vld [vmem:[%s511_s3 + $0x40] sm:$0xff]  ;;  %v135_v21 = vld [vmem:[%s511_s3 + $0x48] sm:$0xff]  ;;  %s231_s12 = sshll.u32 %s387_s11, 4  ;;  %s232_s12 = int_to_ptr.vmem [resolvable:$true] %s231_s12 }
   0x8   :  { %329 = vmatprep.subr.bf16.mxu1 %v328_v12  ;;  %v336_v19 = vpack.c.bf16 %v133_v18, %v132_v17  ;;  %v340_v22 = vpack.c.bf16 %v135_v21, %v134_v20  ;;  %v136_v23 = vld [vmem:[%s511_s3 + $0x50] sm:$0xff]  ;;  %v137_v24 = vld [vmem:[%s511_s3 + $0x58] sm:$0xff]  ;;  %v138_v26 = vld [vmem:[%s511_s3 + $0x60] sm:$0xff]  ;;  %s363_s13 = scalar_lea.vmem %s232_s12, 256  ;;  %p368_p1 = scmp.lt.s32.totalorder %s232_s12, %s232_s12 }
   0x9   :  { %323 = vmatpush3.bf16.msra.mxu0 %v320_v6  ;;  %v344_v25 = vpack.c.bf16 %v137_v24, %v136_v23  ;;  %v139_v27 = vld [vmem:[%s511_s3 + $0x68] sm:$0xff]  ;;  %v140_v29 = vld [vmem:[%s511_s3 + $0x70] sm:$0xff]  ;;  %v141_v30 = vld [vmem:[%s511_s3 + $0x78] sm:$0xff]  ;;  %p364_p0 = scmp.ne.s32.totalorder %s232_s12, %s363_s13  ;;  %p369_p2 = scmp.lt.s32.totalorder %s363_s13, %s363_s13 }
   0xa   :  { %v348_v28 = vpack.c.bf16 %v139_v27, %v138_v26  ;;  %v352_v31 = vpack.c.bf16 %v141_v30, %v140_v29  ;;  %v242_v32 = vld [vmem:[%s510_s2] ss:$0 sm:$0xff] }
   0xb   :  { %331 = vmatpush3.bf16.msra.mxu1 %v328_v12  ;;  %v245_v47 = vld [vmem:[%s512_s4] ss:$0 sm:$0xff]  ;;  %p370_p3 = por %p369_p2, %p368_p1 }
   0xc   :  { %279 = vmatmul.mubr.msk.f32.vlgmr.msra.gmra.mrb[0].mxu0 %vm34_vm0, %v22_v16  ;;  %333 = vmatprep.subr.bf16.mxu1 %v332_v15 }
   0xd   :  { %p371_p4 = pnand %p370_p3, %p364_p0 }
   0xf   :  { %335 = vmatpush3.bf16.msra.mxu1 %v332_v15 }
  0x10   :  { %337 = vmatprep.subr.bf16.mxu1 %v336_v19 }
  0x13   :  { %339 = vmatpush3.bf16.msra.mxu1 %v336_v19 }
  0x14   :  { %341 = vmatprep.subr.bf16.mxu1 %v340_v22 }
  0x17   :  { %343 = vmatpush3.bf16.msra.mxu1 %v340_v22 }
  0x18   :  { %345 = vmatprep.subr.bf16.mxu1 %v344_v25 }
  0x1b   :  { %347 = vmatpush3.bf16.msra.mxu1 %v344_v25 }
  0x1c   :  { %349 = vmatprep.subr.bf16.mxu1 %v348_v28 }
  0x1f   :  { %351 = vmatpush3.bf16.msra.mxu1 %v348_v28 }
  0x20   :  { %353 = vmatprep.subr.bf16.mxu1 %v352_v31 }
  0x23   :  { %355 = vmatpush3.bf16.msra.mxu1 %v352_v31 }
  0xdf   :  { %v280_v33 = vpop.f32.mrb[0].mxu0 }
  0xe0   :  { %v113_v34 = vadd.f32 %v280_v33, %v242_v32  ;;  %v107_v35 = vpop.f32.mrb[1].mxu0 }
  0xe1   :  { %v108_v36 = vadd.f32 %v242_v32, %v107_v35 }
  0xe2   :  { %v119_v37 = vmul.f32 0.70710677, %v113_v34  ;;  %v117_v44 = vmul.f32 0.5, %v113_v34 }
  0xe3   :  { %v118_v38 = vmul.f32 0.70710677, %v108_v36  ;;  %v116_v42 = vmul.f32 0.5, %v108_v36 }
  0xe4   :  { %359 = verf.f32 %v119_v37 }
  0xe5   :  { %361 = verf.f32 %v118_v38 }
  0xee   :  { %v360_v39 = vpop.eup %359 }
  0xef   :  { %v362_v40 = vpop.eup %361  ;;  %v123_v41 = vadd.f32 1.0, %v360_v39 }
  0xf0   :  { %v122_v43 = vadd.f32 1.0, %v362_v40 }
  0xf1   :  { %v125_v46 = vmul.f32 %v123_v41, %v117_v44 }
  0xf2   :  { %v124_v45 = vmul.f32 %v122_v43, %v116_v42 }
  0xf4   :  { %313 = vmatprep.mubr.f32.mxu1 %v124_v45 }
  0xf5   :  { %314 = vmatmul.mubr.f32.vlgmr.msra.gmra.mrb[0].mxu1 %v125_v46 }
 0x1c8   :  { %v315_v48 = vpop.f32.mrb[0].mxu1 }
 0x1c9   :  { %v221_v49 = vadd.f32 %v315_v48, %v245_v47  ;;  %v215_v50 = vpop.f32.mrb[1].mxu1 }
 0x1ca   :  { %v216_v51 = vadd.f32 %v245_v47, %v215_v50 }
 0x1cb   :  { %225 = vst.msk [vmem:[#allocation2 + $0x8] sm:$0xff] %vm34_vm0, %v221_v49 }
 0x1cc   :  { %224 = vst.msk [vmem:[#allocation2] sm:$0xff] %vm34_vm0, %v216_v51 }
 0x1cd   :  { %374 = shalt.err (!%p371_p4)
}
 0x1ce   :  { %s375_s15 = scalar_lea.hbm %s513_s5, 256 }
 0x1cf   :  { %p376_p5 = scmp.ne.s32.totalorder %s513_s5, %s375_s15  ;;  %p379_p6 = scmp.lt.u32.totalorder %s375_s15, %s513_s5 }
 0x1d1   :  { %p381_p7 = pnand %p379_p6, %p376_p5 }
 0x1d3   :  { %384 = shalt.err (!%p381_p7)
}
 0x1d4   :  { %s388_s20 = smov 128   ;;  %s389_s21 = smov 8  }
 0x1d5   :  { %237 = dma.vmem_to_hbm [thread:$0]  %s232_s12, 256, %s513_s5, [#allocation3], %s388_s20, %s388_s20, %s389_s21  }
 0x1d6   :  { %385 = dma.done.wait [#allocation3], 256  }
 0x1d7   :  { %386 = vsyncadd [#allocation3], 4294967040 }
 0x1d8   :  { %241 = vsyncpa [#allocation3], 1 }

</bundles_post_ra>
